<compile_context>
chip_gen: v5e
topology: v5e:2x2
jax: 0.10.0
libtpu: 0.0.40
codegen_flags: <defaults>
</compile_context>

<pallas_src>
import functools

import jax
import jax.numpy as jnp
from jax.experimental import pallas as pl
from jax.experimental.pallas import tpu as pltpu


def _round_up(x, m):
    return (x + m - 1) // m * m


def actor_critic_kernel(x_ref, w1_ref, b1_ref, w2_ref, b2_ref, wh_ref, bh_ref,
                        out_ref, *, action_dim):
    # Shared trunk: Linear -> ReLU -> Linear -> ReLU.
    # MXU contractions accumulate in f32; all elementwise math stays f32
    # (v5e's VPU/EUP have no bf16).  In the bf16 path only the dot operands
    # are bf16.
    h = jnp.dot(x_ref[...], w1_ref[...],
                preferred_element_type=jnp.float32) + b1_ref[...]
    h = jnp.maximum(h, 0.0)
    h = jnp.dot(h.astype(w2_ref.dtype), w2_ref[...],
                preferred_element_type=jnp.float32) + b2_ref[...]
    h = jnp.maximum(h, 0.0)

    # Fused actor+critic head: ONE matmul -> lane-dense (tb, 128) slab.
    # Columns [0:A) = actor logits, column A = critic value, rest = zero pad.
    head = jnp.dot(h.astype(wh_ref.dtype), wh_ref[...],
                   preferred_element_type=jnp.float32) + bh_ref[...]

    # Numerically stable softmax over the first `action_dim` lanes only.
    col = jax.lax.broadcasted_iota(jnp.int32, head.shape, 1)
    is_logit = col < action_dim
    masked_logits = jnp.where(is_logit, head, -jnp.inf)
    m = jnp.max(masked_logits, axis=-1, keepdims=True)
    e = jnp.exp(jnp.where(is_logit, head - m, -jnp.inf))   # exp(-inf) = 0 on masked lanes
    s = jnp.sum(e, axis=-1, keepdims=True)
    probs = e * pl.reciprocal(s, approx=False)              # exact: 1e-5 tolerance holds

    # Single unmasked 128-wide store: probs in logit lanes, value (lane A) /
    # zeros elsewhere.
    out_ref[...] = jnp.where(is_logit, probs, head)


def prepare_params(params, *, use_bf16=False):
    """Build the fused (H, 128)-padded head once (hoisted out of the hot
    forward path).  Optionally cast matmul operands to bf16 (f32 biases)."""
    w1, b1, w2, b2, wa, ba, wc, bc = params
    H = w1.shape[1]
    A = wa.shape[1]
    head_n = max(128, _round_up(A + 1, 128))
    wh = jnp.zeros((H, head_n), jnp.float32).at[:, :A].set(wa).at[:, A:A + 1].set(wc)
    bh = jnp.zeros((1, head_n), jnp.float32).at[:, :A].set(ba).at[:, A:A + 1].set(bc)
    wdt = jnp.bfloat16 if use_bf16 else jnp.float32
    return (w1.astype(wdt), b1.astype(jnp.float32),
            w2.astype(wdt), b2.astype(jnp.float32),
            wh.astype(wdt), bh.astype(jnp.float32))


@functools.partial(jax.jit, static_argnames=("action_dim", "batch_tile"))
def actor_critic_forward(x, prepared, *, action_dim, batch_tile=1024):
    """x: (B, state_dim) float32.  Returns (action_probs (B, A), value (B, 1))."""
    w1, b1, w2, b2, wh, bh = prepared
    B, S = x.shape
    H = w1.shape[1]
    head_n = wh.shape[1]
    A = action_dim

    x = x.astype(w1.dtype)  # bf16 path: halves x DMA bytes

    # Batch tile: large (amortizes per-grid-step overhead / bigger DMA bursts),
    # multiple of 8, and capped at ~half the batch so the grid has >= 2 blocks
    # and v7x's two TensorCores both get work.
    tb = max(8, _round_up(min(batch_tile, B), 8))
    if B > 8:
        tb = min(tb, _round_up((B + 1) // 2, 8))
    b_pad = _round_up(B, tb)
    if b_pad != B:
        x = jnp.pad(x, ((0, b_pad - B), (0, 0)))
    grid = (b_pad // tb,)

    w_itemsize = jnp.dtype(w1.dtype).itemsize
    weight_bytes = (S * H + H * H + H * head_n) * w_itemsize + (2 * H + head_n) * 4
    # x / out double-buffered, weights single-buffered.
    vmem_needed = 2 * tb * S * w_itemsize + 2 * tb * head_n * 4 + weight_bytes
    compiler_kwargs = dict(dimension_semantics=("parallel",))
    if vmem_needed + (4 << 20) > (16 << 20):   # v5e default scoped-VMEM limit
        compiler_kwargs["vmem_limit_bytes"] = int(min(vmem_needed + (8 << 20), 64 << 20))

    cost = pl.CostEstimate(
        flops=2 * b_pad * (S * H + H * H + H * head_n),
        transcendentals=b_pad * head_n,
        bytes_accessed=b_pad * S * w_itemsize + b_pad * head_n * 4 + weight_bytes,
    )

    def pinned(shape):
        # Constant index_map -> stays resident in VMEM; single-buffered.
        return pl.BlockSpec(shape, lambda i: (0, 0), pipeline_mode=pl.Buffered(1))

    kernel = functools.partial(actor_critic_kernel, action_dim=A)
    out = pl.pallas_call(
        kernel,
        out_shape=jax.ShapeDtypeStruct((b_pad, head_n), jnp.float32),
        grid=grid,
        in_specs=[
            pl.BlockSpec((tb, S), lambda i: (i, 0)),   # x: tiled over batch
            pinned((S, H)),                            # w1
            pinned((1, H)),                            # b1
            pinned((H, H)),                            # w2
            pinned((1, H)),                            # b2
            pinned((H, head_n)),                       # fused head weight
            pinned((1, head_n)),                       # fused head bias
        ],
        out_specs=pl.BlockSpec((tb, head_n), lambda i: (i, 0)),
        compiler_params=pltpu.CompilerParams(**compiler_kwargs),
        cost_estimate=cost,
    )(x, w1, b1, w2, b2, wh, bh)

    # Slice the lane-dense slab inside the same jit so XLA fuses the slices
    # with downstream consumers instead of re-reading the slab from HBM.
    probs = out[:B, :A]
    value = out[:B, A:A + 1]
    return probs, value


def init_params(key, state_dim, action_dim, hidden_size):
    """Mimics nn.Linear's default U(-1/sqrt(fan_in), +1/sqrt(fan_in)) init.
    Weights stored (in, out); biases (1, out) for TPU-friendly 2D layout."""
    def linear(k, fan_in, fan_out):
        kw, kb = jax.random.split(k)
        bound = 1.0 / jnp.sqrt(fan_in)
        w = jax.random.uniform(kw, (fan_in, fan_out), jnp.float32, -bound, bound)
        b = jax.random.uniform(kb, (1, fan_out), jnp.float32, -bound, bound)
        return w, b

    k1, k2, k3, k4 = jax.random.split(key, 4)
    w1, b1 = linear(k1, state_dim, hidden_size)
    w2, b2 = linear(k2, hidden_size, hidden_size)
    wa, ba = linear(k3, hidden_size, action_dim)
    wc, bc = linear(k4, hidden_size, 1)
    return (w1, b1, w2, b2, wa, ba, wc, bc)


def reference_forward(x, params):
    """Pure-JAX reference of the PyTorch forward pass."""
    w1, b1, w2, b2, wa, ba, wc, bc = params
    h = jnp.maximum(x @ w1 + b1, 0.0)
    h = jnp.maximum(h @ w2 + b2, 0.0)
    probs = jax.nn.softmax(h @ wa + ba, axis=-1)
    value = h @ wc + bc
    return probs, value


if __name__ == "__main__":
    # Small shapes consistent with the module; B chosen so the batch grid has
    # 2 blocks (>= 2 so both v7x TensorCores would be active) and exercises
    # the row-padding path.
    B, STATE_DIM, ACTION_DIM, HIDDEN = 200, 16, 8, 32

    key = jax.random.PRNGKey(0)
    kx, kp = jax.random.split(key)
    x = jax.random.normal(kx, (B, STATE_DIM), dtype=jnp.float32)
    params = init_params(kp, STATE_DIM, ACTION_DIM, HIDDEN)
    ref_probs, ref_value = reference_forward(x, params)

    # Exact f32 path (1e-5 tolerance).
    prepared = prepare_params(params, use_bf16=False)
    probs, value = actor_critic_forward(x, prepared, action_dim=ACTION_DIM,
                                        batch_tile=1024)
    jax.block_until_ready((probs, value))
    assert probs.shape == (B, ACTION_DIM) and value.shape == (B, 1)
    assert jnp.allclose(probs, ref_probs, atol=1e-5, rtol=1e-5)
    assert jnp.allclose(value, ref_value, atol=1e-5, rtol=1e-5)
    assert jnp.allclose(jnp.sum(probs, axis=-1), 1.0, atol=1e-5)

    # Optional bf16-operand throughput path (v6e/v7x): relaxed tolerance.
    prepared_bf16 = prepare_params(params, use_bf16=True)
    probs_bf, value_bf = actor_critic_forward(x, prepared_bf16,
                                              action_dim=ACTION_DIM,
                                              batch_tile=1024)
    jax.block_until_ready((probs_bf, value_bf))
    assert probs_bf.shape == (B, ACTION_DIM) and value_bf.shape == (B, 1)
    assert jnp.allclose(probs_bf, ref_probs, atol=5e-2)
    assert jnp.allclose(value_bf, ref_value, atol=1e-1, rtol=1e-1)
    assert jnp.allclose(jnp.sum(probs_bf, axis=-1), 1.0, atol=1e-3)

    print("KERNEL_OK")
</pallas_src>

<mosaic_0001>
module attributes {stable_mosaic.version = 11 : i64} {
  func.func @actor_critic_kernel(%arg0: i32, %arg1: memref<104x16xf32, #tpu.memory_space<vmem>>, %arg2: memref<16x32xf32, #tpu.memory_space<vmem>>, %arg3: memref<1x32xf32, #tpu.memory_space<vmem>>, %arg4: memref<32x32xf32, #tpu.memory_space<vmem>>, %arg5: memref<1x32xf32, #tpu.memory_space<vmem>>, %arg6: memref<32x128xf32, #tpu.memory_space<vmem>>, %arg7: memref<1x128xf32, #tpu.memory_space<vmem>>, %arg8: memref<104x128xf32, #tpu.memory_space<vmem>>) attributes {dimension_semantics = [#tpu.dimension_semantics<parallel>], iteration_bounds = array<i64: 2>, scalar_prefetch = 0 : i64, scratch_operands = 0 : i64, tpu.core_type = #tpu.core_type<tc>, window_params = [{transform_indices = @transform_0, window_bounds = array<i64: 104, 16>}, {pipeline_mode = #tpu.pipeline_mode<synchronous>, transform_indices = @transform_1, window_bounds = array<i64: 16, 32>}, {pipeline_mode = #tpu.pipeline_mode<synchronous>, transform_indices = @transform_2, window_bounds = array<i64: 1, 32>}, {pipeline_mode = #tpu.pipeline_mode<synchronous>, transform_indices = @transform_3, window_bounds = array<i64: 32, 32>}, {pipeline_mode = #tpu.pipeline_mode<synchronous>, transform_indices = @transform_4, window_bounds = array<i64: 1, 32>}, {pipeline_mode = #tpu.pipeline_mode<synchronous>, transform_indices = @transform_5, window_bounds = array<i64: 32, 128>}, {pipeline_mode = #tpu.pipeline_mode<synchronous>, transform_indices = @transform_6, window_bounds = array<i64: 1, 128>}, {transform_indices = @transform_7, window_bounds = array<i64: 104, 128>}]} {
    %c0 = arith.constant 0 : index
    %c0_0 = arith.constant 0 : index
    %0 = vector.load %arg1[%c0, %c0_0] : memref<104x16xf32, #tpu.memory_space<vmem>>, vector<104x16xf32>
    %c0_1 = arith.constant 0 : index
    %c0_2 = arith.constant 0 : index
    %1 = vector.load %arg2[%c0_1, %c0_2] : memref<16x32xf32, #tpu.memory_space<vmem>>, vector<16x32xf32>
    %cst = arith.constant dense<0.000000e+00> : vector<104x32xf32>
    %2 = tpu.matmul %0, %1, %cst {dimension_numbers = #tpu.dot_dimension_numbers<[1], [0], [0], [1], [0, 0, 1, 1], [], []>} : vector<104x16xf32>, vector<16x32xf32>, vector<104x32xf32> -> vector<104x32xf32>
    %c0_3 = arith.constant 0 : index
    %c0_4 = arith.constant 0 : index
    %3 = vector.load %arg3[%c0_3, %c0_4] : memref<1x32xf32, #tpu.memory_space<vmem>>, vector<1x32xf32>
    %4 = vector.broadcast %3 : vector<1x32xf32> to vector<104x32xf32>
    %5 = arith.addf %2, %4 : vector<104x32xf32>
    %cst_5 = arith.constant 0.000000e+00 : f32
    %6 = vector.broadcast %cst_5 : f32 to vector<104x32xf32>
    %7 = arith.maximumf %5, %6 : vector<104x32xf32>
    %c0_6 = arith.constant 0 : index
    %c0_7 = arith.constant 0 : index
    %8 = vector.load %arg4[%c0_6, %c0_7] : memref<32x32xf32, #tpu.memory_space<vmem>>, vector<32x32xf32>
    %cst_8 = arith.constant dense<0.000000e+00> : vector<104x32xf32>
    %9 = tpu.matmul %7, %8, %cst_8 {dimension_numbers = #tpu.dot_dimension_numbers<[1], [0], [0], [1], [0, 0, 1, 1], [], []>} : vector<104x32xf32>, vector<32x32xf32>, vector<104x32xf32> -> vector<104x32xf32>
    %c0_9 = arith.constant 0 : index
    %c0_10 = arith.constant 0 : index
    %10 = vector.load %arg5[%c0_9, %c0_10] : memref<1x32xf32, #tpu.memory_space<vmem>>, vector<1x32xf32>
    %11 = vector.broadcast %10 : vector<1x32xf32> to vector<104x32xf32>
    %12 = arith.addf %9, %11 : vector<104x32xf32>
    %cst_11 = arith.constant 0.000000e+00 : f32
    %13 = vector.broadcast %cst_11 : f32 to vector<104x32xf32>
    %14 = arith.maximumf %12, %13 : vector<104x32xf32>
    %c0_12 = arith.constant 0 : index
    %c0_13 = arith.constant 0 : index
    %15 = vector.load %arg6[%c0_12, %c0_13] : memref<32x128xf32, #tpu.memory_space<vmem>>, vector<32x128xf32>
    %cst_14 = arith.constant dense<0.000000e+00> : vector<104x128xf32>
    %16 = tpu.matmul %14, %15, %cst_14 {dimension_numbers = #tpu.dot_dimension_numbers<[1], [0], [0], [1], [0, 0, 1, 1], [], []>} : vector<104x32xf32>, vector<32x128xf32>, vector<104x128xf32> -> vector<104x128xf32>
    %c0_15 = arith.constant 0 : index
    %c0_16 = arith.constant 0 : index
    %17 = vector.load %arg7[%c0_15, %c0_16] : memref<1x128xf32, #tpu.memory_space<vmem>>, vector<1x128xf32>
    %18 = vector.broadcast %17 : vector<1x128xf32> to vector<104x128xf32>
    %19 = arith.addf %16, %18 : vector<104x128xf32>
    %20 = tpu.iota {dimensions = array<i32: 1>} : vector<104x128xi32>
    %c8_i32 = arith.constant 8 : i32
    %21 = vector.broadcast %c8_i32 : i32 to vector<104x128xi32>
    %22 = arith.cmpi slt, %20, %21 : vector<104x128xi32>
    %cst_17 = arith.constant 0xFF800000 : f32
    %23 = vector.broadcast %cst_17 : f32 to vector<104x128xf32>
    %24 = arith.select %22, %19, %23 : vector<104x128xi1>, vector<104x128xf32>
    %cst_18 = arith.constant dense<0xFF800000> : vector<104xf32>
    %25 = vector.multi_reduction <maximumf>, %24, %cst_18 [1] : vector<104x128xf32> to vector<104xf32>
    %26 = vector.shape_cast %25 : vector<104xf32> to vector<104x1xf32>
    %27 = vector.broadcast %26 : vector<104x1xf32> to vector<104x128xf32>
    %28 = arith.subf %19, %27 : vector<104x128xf32>
    %cst_19 = arith.constant 0xFF800000 : f32
    %29 = vector.broadcast %cst_19 : f32 to vector<104x128xf32>
    %30 = arith.select %22, %28, %29 : vector<104x128xi1>, vector<104x128xf32>
    %31 = math.exp %30 : vector<104x128xf32>
    %cst_20 = arith.constant dense<0.000000e+00> : vector<104xf32>
    %32 = vector.multi_reduction <add>, %31, %cst_20 [1] : vector<104x128xf32> to vector<104xf32>
    %33 = vector.shape_cast %32 : vector<104xf32> to vector<104x1xf32>
    %34 = tpu.reciprocal %33 : vector<104x1xf32> -> vector<104x1xf32>
    %35 = vector.broadcast %34 : vector<104x1xf32> to vector<104x128xf32>
    %36 = arith.mulf %31, %35 : vector<104x128xf32>
    %37 = arith.select %22, %36, %19 : vector<104x128xi1>, vector<104x128xf32>
    %c0_21 = arith.constant 0 : index
    %c0_22 = arith.constant 0 : index
    %38 = vector.load %arg8[%c0_21, %c0_22] : memref<104x128xf32, #tpu.memory_space<vmem>>, vector<104x128xf32>
    tpu.vector_store %arg8[%c0_21, %c0_22], %37 {strides = array<i32>} : memref<104x128xf32, #tpu.memory_space<vmem>>, vector<104x128xf32>,
    return
  }
  func.func @transform_0(%arg0: i32) -> (i32, i32) {
    %c0_i32 = arith.constant 0 : i32
    %c0_i32_0 = arith.constant 0 : i32
    return %arg0, %c0_i32 : i32, i32
  }
  func.func @transform_1(%arg0: i32) -> (i32, i32) {
    %c0_i32 = arith.constant 0 : i32
    %c0_i32_0 = arith.constant 0 : i32
    %c0_i32_1 = arith.constant 0 : i32
    return %c0_i32, %c0_i32_0 : i32, i32
  }
  func.func @transform_2(%arg0: i32) -> (i32, i32) {
    %c0_i32 = arith.constant 0 : i32
    %c0_i32_0 = arith.constant 0 : i32
    %c0_i32_1 = arith.constant 0 : i32
    return %c0_i32, %c0_i32_0 : i32, i32
  }
  func.func @transform_3(%arg0: i32) -> (i32, i32) {
    %c0_i32 = arith.constant 0 : i32
    %c0_i32_0 = arith.constant 0 : i32
    %c0_i32_1 = arith.constant 0 : i32
    return %c0_i32, %c0_i32_0 : i32, i32
  }
  func.func @transform_4(%arg0: i32) -> (i32, i32) {
    %c0_i32 = arith.constant 0 : i32
    %c0_i32_0 = arith.constant 0 : i32
    %c0_i32_1 = arith.constant 0 : i32
    return %c0_i32, %c0_i32_0 : i32, i32
  }
  func.func @transform_5(%arg0: i32) -> (i32, i32) {
    %c0_i32 = arith.constant 0 : i32
    %c0_i32_0 = arith.constant 0 : i32
    %c0_i32_1 = arith.constant 0 : i32
    return %c0_i32, %c0_i32_0 : i32, i32
  }
  func.func @transform_6(%arg0: i32) -> (i32, i32) {
    %c0_i32 = arith.constant 0 : i32
    %c0_i32_0 = arith.constant 0 : i32
    %c0_i32_1 = arith.constant 0 : i32
    return %c0_i32, %c0_i32_0 : i32, i32
  }
  func.func @transform_7(%arg0: i32) -> (i32, i32) {
    %c0_i32 = arith.constant 0 : i32
    %c0_i32_0 = arith.constant 0 : i32
    return %arg0, %c0_i32 : i32, i32
  }
}

</mosaic_0001>

<bundles_post_ra>
// kernel: actor_critic_forward.1
= control target key start
LH: loop header
LB: loop body
LE: loop exit
PB: predicated region body
PF: predicated region fallthrough
CT: control target
= control target key end

     0   :  { %s1196_s24 = smov 0   ;;  %s1525_s0 = inlined_call_operand.vmem [shape: f32[208,16], index: 0, kind: input, shape index: {}]   ;;  %s1526_s1 = inlined_call_operand.vmem [shape: f32[16,32], index: 1, kind: input, shape index: {}]   ;;  %s1527_s2 = inlined_call_operand.vmem [shape: f32[1,32], index: 2, kind: input, shape index: {}]   ;;  %s1528_s3 = inlined_call_operand.vmem [shape: f32[32,32], index: 3, kind: input, shape index: {}]   ;;  %s1529_s4 = inlined_call_operand.vmem [shape: f32[1,32], index: 4, kind: input, shape index: {}]   ;;  %s1530_s5 = inlined_call_operand.vmem [shape: f32[32,128], index: 5, kind: input, shape index: {}]   ;;  %s1531_s6 = inlined_call_operand.vmem [shape: f32[1,128], index: 6, kind: input, shape index: {}]   ;;  %s1532_s7 = inlined_call_operand.vmem [shape: f32[208,128], index: 7, kind: output, shape index: {}]  }
   0x1 LB: > { %s1027_s25 = sadd.s32 4294967295, %s1154_s24   ;;  %p1031_p0 = scmp.ge.s32.totalorder %s1154_s24, 1  ;;  %s1154_s24 = sphi %s1196_s24, %s17_s24  }
   0x2   : > { %p238_p1 = scmp.lt.s32.totalorder %s1154_s24, 3 }
   0x4   : > { %p239_p2 = pnand %p1031_p0, %p238_p1 }
   0x5   : > { %s270_s30 = smul.u32 (!%p239_p2), 13, %s1027_s25 }
   0x6   : > { %242 = sbr.rel (%p239_p2) target bundleno = 756 (0x2f4), region = 48 }
   0x7   : > { %p271_p3 = scmp.lt.s32.totalorder (!%p239_p2), %s270_s30, 25 }
   0xb   : > { %v296_v0 = vld [vmem:[%s1526_s1 + $0x8] sm:$0xff]  ;;  %v295_v1 = vld [vmem:[%s1526_s1] sm:$0xff]  ;;  %s1534_s30 = smov (!%p271_p3, %s270_s30), 25  ;;  %vm301_vm0 = vcmask 130048   ;;  %v413_v11 = vld [vmem:[%s1528_s3 + $0x18] sm:$0xff]  ;;  %vm418_vm1 = vcmask 261120  }
   0xc   : > { %355 = vmatpush.msra.mxu0 %v296_v0  ;;  %1075 = vmatpush.msra.mxu3 %v296_v0  ;;  %s1032_s8 = sshll.u32 %s1534_s30, 3  ;;  %v412_v16 = vld [vmem:[%s1528_s3 + $0x10] sm:$0xff]  ;;  %v411_v17 = vld [vmem:[%s1528_s3 + $0x8] sm:$0xff]  ;;  %v410_v18 = vld [vmem:[%s1528_s3] sm:$0xff] }
   0xd   : > { %s274_s11 = scalar_lea.vmem %s1525_s0, %s1032_s8  ;;  %470 = vmatpush.msra.mxu1 %v413_v11  ;;  %v1093_v19 = vld [vmem:[%s1527_s2] ss:$0 sm:$0xff]  ;;  %v530_v47 = vld [vmem:[%s1530_s5 + $0x18] sm:$0xff]  ;;  %v529_v60 = vld [vmem:[%s1530_s5 + $0x10] sm:$0xff]  ;;  %s1441_s16 = scalar_lea.vmem %s1532_s7, %s1032_s8 }
   0xe   : > { %356 = vmatpush.msra.mxu0 %v295_v1  ;;  %1076 = vmatpush.msra.mxu3 %v295_v1  ;;  %v282_v2 = vld [vmem:[%s274_s11] sm:$0xff]  ;;  %v283_v3 = vld [vmem:[%s274_s11 + $0x8] sm:$0xff]  ;;  %v284_v4 = vld [vmem:[%s274_s11 + $0x10] sm:$0xff] }
   0xf   : > { %1034 = vmatmul.msk.f32.vlgmr.msra.gmra.mxu0 %vm301_vm0, %v282_v2  ;;  %v292_v5 = vld [vmem:[%s274_s11 + $0x50] sm:$0xff]  ;;  %v285_v6 = vld [vmem:[%s274_s11 + $0x18] sm:$0xff]  ;;  %v286_v8 = vld [vmem:[%s274_s11 + $0x20] sm:$0xff]  ;;  %471 = vmatpush.msra.mxu1 %v412_v16 }
  0x10   : > { %1044 = vmatmul.msk.f32.vlgmr.msra.gmra.mxu3 %vm301_vm0, %v292_v5  ;;  %v293_v7 = vld [vmem:[%s274_s11 + $0x58] sm:$0xff]  ;;  %v294_v9 = vld [vmem:[%s274_s11 + $0x60] sm:$0xff]  ;;  %v287_v10 = vld [vmem:[%s274_s11 + $0x28] sm:$0xff]  ;;  %586 = vmatpush.msra.mxu2 %v530_v47 }
  0x11   : > { %1077 = vmatpush.msrb.mxu3 %v413_v11  ;;  %v288_v12 = vld [vmem:[%s274_s11 + $0x30] sm:$0xff]  ;;  %v289_v13 = vld [vmem:[%s274_s11 + $0x38] sm:$0xff]  ;;  %v290_v14 = vld [vmem:[%s274_s11 + $0x40] sm:$0xff]  ;;  %472 = vmatpush.msra.mxu1 %v411_v17 }
  0x12   : > { %v291_v15 = vld [vmem:[%s274_s11 + $0x48] sm:$0xff]  ;;  %587 = vmatpush.msra.mxu2 %v529_v60  ;;  %v527_v62 = vld [vmem:[%s1530_s5] sm:$0xff] }
  0x13   : > { %1078 = vmatpush.msrb.mxu3 %v412_v16  ;;  %473 = vmatpush.msra.mxu1 %v410_v18  ;;  %v528_v61 = vld [vmem:[%s1530_s5 + $0x8] sm:$0xff]  ;;  %v1094_v63 = vld [vmem:[%s1529_s4] ss:$0 sm:$0xff] }
  0x14   : > { %588 = vmatpush.msra.mxu2 %v528_v61 }
  0x15   : > { %1079 = vmatpush.msrb.mxu3 %v411_v17 }
  0x16   : > { %589 = vmatpush.msra.mxu2 %v527_v62 }
  0x17   : > { %1035 = vmatmul.msk.f32.gmra.mxu0 %vm301_vm0, %v283_v3  ;;  %1080 = vmatpush.msrb.mxu3 %v410_v18 }
  0x18   : > { %1045 = vmatmul.msk.f32.gmra.mxu3 %vm301_vm0, %v293_v7 }
  0x19   : > { %1081 = vmatpush.msra.mxu3 %v530_v47 }
  0x1b   : > { %1082 = vmatpush.msra.mxu3 %v529_v60 }
  0x1d   : > { %1083 = vmatpush.msra.mxu3 %v528_v61 }
  0x1f   : > { %1036 = vmatmul.msk.f32.gmra.mxu0 %vm301_vm0, %v284_v4  ;;  %1084 = vmatpush.msra.mxu3 %v527_v62 }
  0x20   : > { %1046 = vmatmul.msk.f32.gmra.mxu3 %vm301_vm0, %v294_v9 }
  0x27   : > { %1037 = vmatmul.msk.f32.gmra.mxu0 %vm301_vm0, %v285_v6 }
  0x2f   : > { %1038 = vmatmul.msk.f32.gmra.mxu0 %vm301_vm0, %v286_v8 }
  0x37   : > { %1039 = vmatmul.msk.f32.gmra.mxu0 %vm301_vm0, %v287_v10 }
  0x3f   : > { %1040 = vmatmul.msk.f32.gmra.mxu0 %vm301_vm0, %v288_v12 }
  0x47   : > { %1041 = vmatmul.msk.f32.gmra.mxu0 %vm301_vm0, %v289_v13 }
  0x4f   : > { %1042 = vmatmul.msk.f32.gmra.mxu0 %vm301_vm0, %v290_v14 }
  0x57   : > { %1043 = vmatmul.msk.f32.gmra.mxu0 %vm301_vm0, %v291_v15 }
  0x8c   : > { %v358_v20 = vpop.f32.mrf.mxu0 }
  0x8d   : > { %v359_v21 = vadd.f32 %v1093_v19, %v358_v20 }
  0x8f   : > { %v397_v22 = vmax.f32 %v359_v21, 0.0 }
  0x91   : > { %1047 = vmatmul.msk.f32.vlgmr.msra.gmra.mxu1 %vm418_vm1, %v397_v22 }
  0x93   : > { %v388_v31 = vpop.f32.mrf.mxu3 }
  0x94   : > { %v361_v23 = vpop.f32.mrf.mxu0  ;;  %v389_v33 = vadd.f32 %v1093_v19, %v388_v31 }
  0x95   : > { %v362_v24 = vadd.f32 %v1093_v19, %v361_v23 }
  0x96   : > { %v407_v34 = vmax.f32 %v389_v33, 0.0 }
  0x97   : > { %v398_v25 = vmax.f32 %v362_v24, 0.0 }
  0x98   : > { %1057 = vmatmul.msk.f32.vlgmr.msrb.gmra.mxu3 %vm418_vm1, %v407_v34 }
  0x99   : > { %1048 = vmatmul.msk.f32.gmra.mxu1 %vm418_vm1, %v398_v25 }
  0x9b   : > { %v391_v37 = vpop.f32.mrf.mxu3 }
  0x9c   : > { %v364_v26 = vpop.f32.mrf.mxu0  ;;  %v392_v39 = vadd.f32 %v1093_v19, %v391_v37 }
  0x9d   : > { %v365_v27 = vadd.f32 %v1093_v19, %v364_v26 }
  0x9e   : > { %v408_v40 = vmax.f32 %v392_v39, 0.0  ;;  %v630_v39 = vlaneseq }
  0x9f   : > { %v399_v28 = vmax.f32 %v365_v27, 0.0 }
  0xa0   : > { %1058 = vmatmul.msk.f32.gmra.mxu3 %vm418_vm1, %v408_v40  ;;  %v1287_v40 = vand.u32 127, %v630_v39 }
  0xa1   : > { %1049 = vmatmul.msk.f32.gmra.mxu1 %vm418_vm1, %v399_v28 }
  0xa2   : > { %vm632_vm2 = vcmp.lt.s32.totalorder %v1287_v40, 8 }
  0xa3   : > { %v394_v43 = vpop.f32.mrf.mxu3 }
  0xa4   : > { %v367_v29 = vpop.f32.mrf.mxu0  ;;  %v395_v45 = vadd.f32 %v1093_v19, %v394_v43 }
  0xa5   : > { %v368_v30 = vadd.f32 %v1093_v19, %v367_v29 }
  0xa6   : > { %v409_v46 = vmax.f32 %v395_v45, 0.0 }
  0xa7   : > { %v400_v32 = vmax.f32 %v368_v30, 0.0 }
  0xa8   : > { %1059 = vmatmul.msk.f32.gmra.mxu3 %vm418_vm1, %v409_v46 }
  0xa9   : > { %1050 = vmatmul.msk.f32.gmra.mxu1 %vm418_vm1, %v400_v32 }
  0xac   : > { %v370_v35 = vpop.f32.mrf.mxu0 }
  0xad   : > { %v371_v36 = vadd.f32 %v1093_v19, %v370_v35 }
  0xaf   : > { %v401_v38 = vmax.f32 %v371_v36, 0.0 }
  0xb1   : > { %1051 = vmatmul.msk.f32.gmra.mxu1 %vm418_vm1, %v401_v38 }
  0xb4   : > { %v373_v41 = vpop.f32.mrf.mxu0 }
  0xb5   : > { %v374_v42 = vadd.f32 %v1093_v19, %v373_v41  ;;  %v1095_v41 = vld [vmem:[%s1531_s6] ss:$0 sm:$0xff] }
  0xb7   : > { %v402_v44 = vmax.f32 %v374_v42, 0.0 }
  0xb9   : > { %1052 = vmatmul.msk.f32.gmra.mxu1 %vm418_vm1, %v402_v44 }
  0xbc   : > { %v376_v48 = vpop.f32.mrf.mxu0 }
  0xbd   : > { %v377_v49 = vadd.f32 %v1093_v19, %v376_v48 }
  0xbf   : > { %v403_v50 = vmax.f32 %v377_v49, 0.0 }
  0xc1   : > { %1053 = vmatmul.msk.f32.gmra.mxu1 %vm418_vm1, %v403_v50 }
  0xc4   : > { %v379_v51 = vpop.f32.mrf.mxu0 }
  0xc5   : > { %v380_v52 = vadd.f32 %v1093_v19, %v379_v51 }
  0xc7   : > { %v404_v53 = vmax.f32 %v380_v52, 0.0 }
  0xc9   : > { %1054 = vmatmul.msk.f32.gmra.mxu1 %vm418_vm1, %v404_v53 }
  0xcc   : > { %v382_v54 = vpop.f32.mrf.mxu0 }
  0xcd   : > { %v383_v55 = vadd.f32 %v1093_v19, %v382_v54 }
  0xcf   : > { %v405_v56 = vmax.f32 %v383_v55, 0.0 }
  0xd1   : > { %1055 = vmatmul.msk.f32.gmra.mxu1 %vm418_vm1, %v405_v56 }
  0xd4   : > { %v385_v57 = vpop.f32.mrf.mxu0 }
  0xd5   : > { %v386_v58 = vadd.f32 %v1093_v19, %v385_v57 }
  0xd7   : > { %v406_v59 = vmax.f32 %v386_v58, 0.0 }
  0xd9   : > { %1056 = vmatmul.msk.f32.gmra.mxu1 %vm418_vm1, %v406_v59 }
 0x10e   : > { %v475_v0 = vpop.f32.mrf.mxu1 }
 0x10f   : > { %v476_v1 = vadd.f32 %v1094_v63, %v475_v0 }
 0x111   : > { %v514_v2 = vmax.f32 %v476_v1, 0.0 }
 0x113   : > { %1060 = vmatmul.msk.f32.vlgmr.msra.gmra.mxu2 %vm418_vm1, %v514_v2 }
 0x116   : > { %v478_v3 = vpop.f32.mrf.mxu1 }
 0x117   : > { %v479_v4 = vadd.f32 %v1094_v63, %v478_v3 }
 0x119   : > { %v515_v5 = vmax.f32 %v479_v4, 0.0 }
 0x11b   : > { %1061 = vmatmul.msk.f32.gmra.mxu2 %vm418_vm1, %v515_v5  ;;  %v505_v13 = vpop.f32.mrf.mxu3 }
 0x11c   : > { %v506_v15 = vadd.f32 %v1094_v63, %v505_v13 }
 0x11e   : > { %v481_v6 = vpop.f32.mrf.mxu1  ;;  %v524_v17 = vmax.f32 %v506_v15, 0.0 }
 0x11f   : > { %v482_v7 = vadd.f32 %v1094_v63, %v481_v6 }
 0x120   : > { %1070 = vmatmul.msk.f32.vlgmr.msra.gmra.mxu3 %vm418_vm1, %v524_v17 }
 0x121   : > { %v516_v8 = vmax.f32 %v482_v7, 0.0 }
 0x123   : > { %1062 = vmatmul.msk.f32.gmra.mxu2 %vm418_vm1, %v516_v8  ;;  %v508_v19 = vpop.f32.mrf.mxu3 }
 0x124   : > { %v509_v21 = vadd.f32 %v1094_v63, %v508_v19 }
 0x126   : > { %v484_v9 = vpop.f32.mrf.mxu1  ;;  %v525_v23 = vmax.f32 %v509_v21, 0.0 }
 0x127   : > { %v485_v10 = vadd.f32 %v1094_v63, %v484_v9 }
 0x128   : > { %1071 = vmatmul.msk.f32.gmra.mxu3 %vm418_vm1, %v525_v23 }
 0x129   : > { %v517_v11 = vmax.f32 %v485_v10, 0.0 }
 0x12b   : > { %1063 = vmatmul.msk.f32.gmra.mxu2 %vm418_vm1, %v517_v11  ;;  %v511_v25 = vpop.f32.mrf.mxu3 }
 0x12c   : > { %v512_v27 = vadd.f32 %v1094_v63, %v511_v25 }
 0x12e   : > { %v487_v12 = vpop.f32.mrf.mxu1  ;;  %v526_v29 = vmax.f32 %v512_v27, 0.0 }
 0x12f   : > { %v488_v14 = vadd.f32 %v1094_v63, %v487_v12 }
 0x130   : > { %1072 = vmatmul.msk.f32.gmra.mxu3 %vm418_vm1, %v526_v29 }
 0x131   : > { %v518_v16 = vmax.f32 %v488_v14, 0.0 }
 0x133   : > { %1064 = vmatmul.msk.f32.gmra.mxu2 %vm418_vm1, %v518_v16 }
 0x136   : > { %v490_v18 = vpop.f32.mrf.mxu1 }
 0x137   : > { %v491_v20 = vadd.f32 %v1094_v63, %v490_v18 }
 0x139   : > { %v519_v22 = vmax.f32 %v491_v20, 0.0 }
 0x13b   : > { %1065 = vmatmul.msk.f32.gmra.mxu2 %vm418_vm1, %v519_v22 }
 0x13e   : > { %v493_v24 = vpop.f32.mrf.mxu1 }
 0x13f   : > { %v494_v26 = vadd.f32 %v1094_v63, %v493_v24 }
 0x141   : > { %v520_v28 = vmax.f32 %v494_v26, 0.0 }
 0x143   : > { %1066 = vmatmul.msk.f32.gmra.mxu2 %vm418_vm1, %v520_v28 }
 0x146   : > { %v496_v30 = vpop.f32.mrf.mxu1 }
 0x147   : > { %v497_v31 = vadd.f32 %v1094_v63, %v496_v30 }
 0x149   : > { %v521_v32 = vmax.f32 %v497_v31, 0.0 }
 0x14b   : > { %1067 = vmatmul.msk.f32.gmra.mxu2 %vm418_vm1, %v521_v32 }
 0x14e   : > { %v499_v33 = vpop.f32.mrf.mxu1 }
 0x14f   : > { %v500_v34 = vadd.f32 %v1094_v63, %v499_v33 }
 0x151   : > { %v522_v35 = vmax.f32 %v500_v34, 0.0 }
 0x153   : > { %1068 = vmatmul.msk.f32.gmra.mxu2 %vm418_vm1, %v522_v35 }
 0x156   : > { %v502_v36 = vpop.f32.mrf.mxu1 }
 0x157   : > { %v503_v37 = vadd.f32 %v1094_v63, %v502_v36 }
 0x159   : > { %v523_v38 = vmax.f32 %v503_v37, 0.0 }
 0x15b   : > { %1069 = vmatmul.msk.f32.gmra.mxu2 %vm418_vm1, %v523_v38 }
 0x196   : > { %v591_v42 = vpop.f32.mrf.mxu2 }
 0x197   : > { %v1293_v43 = vadd.f32 %v1095_v41, %v591_v42 }
 0x199   : > { %v633_v44 = vsel %vm632_vm2, %v1293_v43, -inf }
 0x19a   : > { %646 = vmax.xlane.f32.xlu0 %v633_v44 }
 0x19e   : > { %v594_v45 = vpop.f32.mrf.mxu2 }
 0x19f   : > { %v1298_v46 = vadd.f32 %v1095_v41, %v594_v45 }
 0x1a1   : > { %v634_v47 = vsel %vm632_vm2, %v1298_v46, -inf }
 0x1a2   : > { %648 = vmax.xlane.f32.xlu0 %v634_v47 }
 0x1a3   : > { %v621_v63 = vpop.f32.mrf.mxu3 }
 0x1a4   : > { %v1333_v3 = vadd.f32 %v1095_v41, %v621_v63 }
 0x1a6   : > { %v597_v48 = vpop.f32.mrf.mxu2  ;;  %v643_v7 = vsel %vm632_vm2, %v1333_v3, -inf }
 0x1a7   : > { %v1303_v49 = vadd.f32 %v1095_v41, %v597_v48 }
 0x1a9   : > { %v635_v50 = vsel %vm632_vm2, %v1303_v49, -inf }
 0x1aa   : > { %650 = vmax.xlane.f32.xlu1 %v635_v50 }
 0x1ab   : > { %v624_v5 = vpop.f32.mrf.mxu3 }
 0x1ac   : > { %v1343_v9 = vadd.f32 %v1095_v41, %v624_v5 }
 0x1ae   : > { %v600_v51 = vpop.f32.mrf.mxu2  ;;  %v644_v12 = vsel %vm632_vm2, %v1343_v9, -inf }
 0x1af   : > { %v1308_v52 = vadd.f32 %v1095_v41, %v600_v51 }
 0x1b1   : > { %v636_v53 = vsel %vm632_vm2, %v1308_v52, -inf }
 0x1b2   : > { %652 = vmax.xlane.f32.xlu1 %v636_v53 }
 0x1b3   : > { %v627_v13 = vpop.f32.mrf.mxu3 }
 0x1b4   : > { %v1353_v15 = vadd.f32 %v1095_v41, %v627_v13 }
 0x1b6   : > { %v603_v54 = vpop.f32.mrf.mxu2  ;;  %v645_v16 = vsel %vm632_vm2, %v1353_v15, -inf }
 0x1b7   : > { %v1313_v55 = vadd.f32 %v1095_v41, %v603_v54 }
 0x1b9   : > { %v637_v56 = vsel %vm632_vm2, %v1313_v55, -inf }
 0x1ba   : > { %654 = vmax.xlane.f32.xlu2 %v637_v56 }
 0x1be   : > { %v606_v57 = vpop.f32.mrf.mxu2 }
 0x1bf   : > { %v1318_v58 = vadd.f32 %v1095_v41, %v606_v57 }
 0x1c1   : > { %v638_v59 = vsel %vm632_vm2, %v1318_v58, -inf }
 0x1c2   : > { %656 = vmax.xlane.f32.xlu2 %v638_v59 }
 0x1c6   : > { %v609_v60 = vpop.f32.mrf.mxu2 }
 0x1c7   : > { %v1323_v61 = vadd.f32 %v1095_v41, %v609_v60 }
 0x1c9   : > { %v639_v62 = vsel %vm632_vm2, %v1323_v61, -inf }
 0x1ca   : > { %658 = vmax.xlane.f32.xlu0 %v639_v62 }
 0x1ce   : > { %v612_v0 = vpop.f32.mrf.mxu2 }
 0x1cf   : > { %v1328_v1 = vadd.f32 %v1095_v41, %v612_v0 }
 0x1d1   : > { %v640_v2 = vsel %vm632_vm2, %v1328_v1, -inf }
 0x1d2   : > { %660 = vmax.xlane.f32.xlu1 %v640_v2 }
 0x1d6   : > { %v615_v4 = vpop.f32.mrf.mxu2 }
 0x1d7   : > { %v1335_v6 = vadd.f32 %v1095_v41, %v615_v4 }
 0x1d9   : > { %v641_v8 = vsel %vm632_vm2, %v1335_v6, -inf }
 0x1da   : > { %662 = vmax.xlane.f32.xlu2 %v641_v8  ;;  %666 = vmax.xlane.f32.xlu1 %v643_v7 }
 0x1de   : > { %v618_v10 = vpop.f32.mrf.mxu2 }
 0x1df   : > { %v1345_v11 = vadd.f32 %v1095_v41, %v618_v10 }
 0x1e1   : > { %v642_v14 = vsel %vm632_vm2, %v1345_v11, -inf }
 0x1e2   : > { %668 = vmax.xlane.f32.xlu2 %v644_v12  ;;  %664 = vmax.xlane.f32.xlu0 %v642_v14 }
 0x1ea   : > { %670 = vmax.xlane.f32.xlu0 %v645_v16 }
 0x20d   : > { %v647_v17 = vpop.xlane.xlu0 %646 }
 0x20e   : > { %v672_v18 = vsub.f32 %v1293_v43, %v647_v17 }
 0x210   : > { %v685_v19 = vsel %vm632_vm2, %v672_v18, -inf }
 0x211   : > { %v698_v20 = vmul.f32 1.442695, %v685_v19 }
 0x213   : > { %1096 = vpow2.f32 %v698_v20 }
 0x215   : > { %v649_v21 = vpop.xlane.xlu0 %648 }
 0x216   : > { %v673_v22 = vsub.f32 %v1298_v46, %v649_v21 }
 0x218   : > { %v686_v23 = vsel %vm632_vm2, %v673_v22, -inf }
 0x219   : > { %v1364_v24 = vpop.eup %1096  ;;  %v700_v25 = vmul.f32 1.442695, %v686_v23 }
 0x21a   : > { %724 = vadd.xlane.f32.xlu1 %v1364_v24 }
 0x21b   : > { %1098 = vpow2.f32 %v700_v25 }
 0x21d   : > { %v651_v26 = vpop.xlane.xlu1 %650 }
 0x21e   : > { %v674_v27 = vsub.f32 %v1303_v49, %v651_v26 }
 0x220   : > { %v687_v28 = vsel %vm632_vm2, %v674_v27, -inf }
 0x221   : > { %v1370_v29 = vpop.eup %1098  ;;  %v702_v30 = vmul.f32 1.442695, %v687_v28 }
 0x222   : > { %726 = vadd.xlane.f32.xlu2 %v1370_v29 }
 0x223   : > { %1100 = vpow2.f32 %v702_v30 }
 0x225   : > { %v653_v31 = vpop.xlane.xlu1 %652 }
 0x226   : > { %v675_v32 = vsub.f32 %v1308_v52, %v653_v31 }
 0x228   : > { %v688_v33 = vsel %vm632_vm2, %v675_v32, -inf }
 0x229   : > { %v1376_v34 = vpop.eup %1100  ;;  %v704_v35 = vmul.f32 1.442695, %v688_v33 }
 0x22a   : > { %728 = vadd.xlane.f32.xlu0 %v1376_v34 }
 0x22b   : > { %1102 = vpow2.f32 %v704_v35 }
 0x22d   : > { %v655_v36 = vpop.xlane.xlu2 %654 }
 0x22e   : > { %v676_v37 = vsub.f32 %v1313_v55, %v655_v36 }
 0x230   : > { %v689_v38 = vsel %vm632_vm2, %v676_v37, -inf }
 0x231   : > { %v1382_v39 = vpop.eup %1102  ;;  %v706_v41 = vmul.f32 1.442695, %v689_v38 }
 0x232   : > { %730 = vadd.xlane.f32.xlu1 %v1382_v39 }
 0x233   : > { %1104 = vpow2.f32 %v706_v41 }
 0x235   : > { %v657_v42 = vpop.xlane.xlu2 %656 }
 0x236   : > { %v677_v44 = vsub.f32 %v1318_v58, %v657_v42 }
 0x238   : > { %v690_v45 = vsel %vm632_vm2, %v677_v44, -inf }
 0x239   : > { %v1388_v47 = vpop.eup %1104  ;;  %v708_v48 = vmul.f32 1.442695, %v690_v45 }
 0x23a   : > { %732 = vadd.xlane.f32.xlu2 %v1388_v47 }
 0x23b   : > { %1106 = vpow2.f32 %v708_v48 }
 0x23d   : > { %v659_v50 = vpop.xlane.xlu0 %658 }
 0x23e   : > { %v678_v51 = vsub.f32 %v1323_v61, %v659_v50 }
 0x240   : > { %v691_v53 = vsel %vm632_vm2, %v678_v51, -inf }
 0x241   : > { %v1394_v54 = vpop.eup %1106  ;;  %v710_v56 = vmul.f32 1.442695, %v691_v53 }
 0x242   : > { %734 = vadd.xlane.f32.xlu0 %v1394_v54 }
 0x243   : > { %1108 = vpow2.f32 %v710_v56 }
 0x245   : > { %v661_v57 = vpop.xlane.xlu1 %660 }
 0x246   : > { %v679_v59 = vsub.f32 %v1328_v1, %v661_v57 }
 0x248   : > { %v692_v60 = vsel %vm632_vm2, %v679_v59, -inf }
 0x249   : > { %v1400_v62 = vpop.eup %1108  ;;  %v712_v63 = vmul.f32 1.442695, %v692_v60 }
 0x24a   : > { %736 = vadd.xlane.f32.xlu1 %v1400_v62 }
 0x24b   : > { %1110 = vpow2.f32 %v712_v63 }
 0x24d   : > { %v663_v0 = vpop.xlane.xlu2 %662  ;;  %v667_v2 = vpop.xlane.xlu1 %666 }
 0x24e   : > { %v680_v4 = vsub.f32 %v1335_v6, %v663_v0  ;;  %v682_v5 = vsub.f32 %v1333_v3, %v667_v2 }
 0x250   : > { %v693_v7 = vsel %vm632_vm2, %v680_v4, -inf  ;;  %v695_v8 = vsel %vm632_vm2, %v682_v5, -inf }
 0x251   : > { %v1409_v10 = vpop.eup %1110  ;;  %v714_v12 = vmul.f32 1.442695, %v693_v7  ;;  %v718_v13 = vmul.f32 1.442695, %v695_v8 }
 0x252   : > { %738 = vadd.xlane.f32.xlu2 %v1409_v10 }
 0x253   : > { %1112 = vpow2.f32 %v714_v12 }
 0x254   : > { %1114 = vpow2.f32 %v718_v13 }
 0x255   : > { %v669_v14 = vpop.xlane.xlu2 %668  ;;  %v665_v16 = vpop.xlane.xlu0 %664 }
 0x256   : > { %v683_v17 = vsub.f32 %v1343_v9, %v669_v14  ;;  %v681_v18 = vsub.f32 %v1345_v11, %v665_v16 }
 0x258   : > { %v696_v19 = vsel %vm632_vm2, %v683_v17, -inf  ;;  %v694_v20 = vsel %vm632_vm2, %v681_v18, -inf }
 0x259   : > { %v1418_v21 = vpop.eup %1112  ;;  %v720_v22 = vmul.f32 1.442695, %v696_v19  ;;  %v716_v23 = vmul.f32 1.442695, %v694_v20 }
 0x25a   : > { %v1420_v25 = vpop.eup %1114  ;;  %740 = vadd.xlane.f32.xlu0 %v1418_v21 }
 0x25b   : > { %1116 = vpow2.f32 %v720_v22  ;;  %744 = vadd.xlane.f32.xlu2 %v1420_v25 }
 0x25c   : > { %1118 = vpow2.f32 %v716_v23 }
 0x25d   : > { %v671_v26 = vpop.xlane.xlu0 %670 }
 0x25e   : > { %v684_v27 = vsub.f32 %v1353_v15, %v671_v26 }
 0x260   : > { %v697_v28 = vsel %vm632_vm2, %v684_v27, -inf }
 0x261   : > { %v1427_v30 = vpop.eup %1116  ;;  %v722_v31 = vmul.f32 1.442695, %v697_v28 }
 0x262   : > { %v1429_v32 = vpop.eup %1118  ;;  %746 = vadd.xlane.f32.xlu0 %v1427_v30 }
 0x263   : > { %1120 = vpow2.f32 %v722_v31  ;;  %742 = vadd.xlane.f32.xlu1 %v1429_v32 }
 0x269   : > { %v1433_v33 = vpop.eup %1120 }
 0x26b   : > { %748 = vadd.xlane.f32.xlu1 %v1433_v33 }
 0x28d   : > { %v725_v35 = vpop.xlane.xlu1 %724 }
 0x28e   : > { %1122 = vrcp.f32 %v725_v35  ;;  %v761_v42 = vand.u32 2147483648, %v725_v35  ;;  %v759_v45 = vand.u32 2147483647, %v725_v35  ;;  %vm755_vm4 = vweird.f32 %v725_v35 }
 0x290   : > { %v762_v51 = vor.u32 1.1754944e-38, %v761_v42  ;;  %vm760_vm6 = vcmp.eq.f32.partialorder %v759_v45, 8.507059e+37 }
 0x294   : > { %v1123_v36 = vpop.eup %1122 }
 0x295   : > { %v751_v37 = vmul.f32 %v1123_v36, %v725_v35  ;;  %v727_v38 = vpop.xlane.xlu2 %726  ;;  %vm756_vm3 = vweird.f32 %v1123_v36 }
 0x296   : > { %1124 = vrcp.f32 %v727_v38  ;;  %vm757_vm5 = vmor %vm755_vm4, %vm756_vm3  ;;  %v775_v0 = vand.u32 2147483648, %v727_v38  ;;  %v773_v5 = vand.u32 2147483647, %v727_v38  ;;  %vm769_vm8 = vweird.f32 %v727_v38 }
 0x297   : > { %v752_v41 = vsub.f32 1.0, %v751_v37 }
 0x298   : > { %v776_v12 = vor.u32 1.1754944e-38, %v775_v0  ;;  %vm774_vm10 = vcmp.eq.f32.partialorder %v773_v5, 8.507059e+37 }
 0x299   : > { %v753_v44 = vmul.f32 %v1123_v36, %v752_v41 }
 0x29b   : > { %v754_v48 = vadd.f32 %v1123_v36, %v753_v44 }
 0x29c   : > { %v1125_v50 = vpop.eup %1124 }
 0x29d   : > { %v758_v53 = vsel %vm757_vm5, %v1123_v36, %v754_v48  ;;  %v765_v56 = vmul.f32 %v1125_v50, %v727_v38  ;;  %v729_v57 = vpop.xlane.xlu0 %728  ;;  %vm770_vm7 = vweird.f32 %v1125_v50 }
 0x29e   : > { %v763_v59 = vsel %vm760_vm6, %v762_v51, %v758_v53  ;;  %1126 = vrcp.f32 %v729_v57  ;;  %vm771_vm9 = vmor %vm769_vm8, %vm770_vm7  ;;  %v787_v22 = vand.u32 2147483647, %v729_v57  ;;  %vm783_vm12 = vweird.f32 %v729_v57 }
 0x29f   : > { %v932_v60 = vmul.f32 %v1364_v24, %v763_v59  ;;  %v766_v63 = vsub.f32 1.0, %v765_v56 }
 0x2a0   : > { %vm788_vm14 = vcmp.eq.f32.partialorder %v787_v22, 8.507059e+37 }
 0x2a1   : > { %v945_v2 = vsel %vm632_vm2, %v932_v60, %v1293_v43  ;;  %v767_v4 = vmul.f32 %v1125_v50, %v766_v63  ;;  %v789_v43 = vand.u32 2147483648, %v729_v57 }
 0x2a2   : > { %958 = vst [vmem:[%s1441_s16] sm:$0xff] %v945_v2 }
 0x2a3   : > { %v768_v7 = vadd.f32 %v1125_v50, %v767_v4  ;;  %v790_v27 = vor.u32 1.1754944e-38, %v789_v43 }
 0x2a4   : > { %v1127_v8 = vpop.eup %1126 }
 0x2a5   : > { %v772_v13 = vsel %vm771_vm9, %v1125_v50, %v768_v7  ;;  %v779_v14 = vmul.f32 %v1127_v8, %v729_v57  ;;  %v731_v24 = vpop.xlane.xlu1 %730  ;;  %vm784_vm11 = vweird.f32 %v1127_v8 }
 0x2a6   : > { %v777_v16 = vsel %vm774_vm10, %v776_v12, %v772_v13  ;;  %1128 = vrcp.f32 %v731_v24  ;;  %vm785_vm13 = vmor %vm783_vm12, %vm784_vm11  ;;  %v801_v42 = vand.u32 2147483647, %v731_v24  ;;  %vm797_vm0 = vweird.f32 %v731_v24 }
 0x2a7   : > { %v933_v17 = vmul.f32 %v1370_v29, %v777_v16  ;;  %v780_v18 = vsub.f32 1.0, %v779_v14 }
 0x2a8   : > { %vm802_vm3 = vcmp.eq.f32.partialorder %v801_v42, 8.507059e+37 }
 0x2a9   : > { %v946_v19 = vsel %vm632_vm2, %v933_v17, %v1298_v46  ;;  %v781_v20 = vmul.f32 %v1127_v8, %v780_v18  ;;  %v803_v46 = vand.u32 2147483648, %v731_v24 }
 0x2aa   : > { %959 = vst [vmem:[%s1441_s16 + $0x8] sm:$0xff] %v946_v19 }
 0x2ab   : > { %v782_v23 = vadd.f32 %v1127_v8, %v781_v20  ;;  %v804_v48 = vor.u32 1.1754944e-38, %v803_v46 }
 0x2ac   : > { %v1129_v26 = vpop.eup %1128 }
 0x2ad   : > { %v786_v28 = vsel %vm785_vm13, %v1127_v8, %v782_v23  ;;  %v793_v31 = vmul.f32 %v1129_v26, %v731_v24  ;;  %v733_v29 = vpop.xlane.xlu2 %732  ;;  %vm798_vm15 = vweird.f32 %v1129_v26 }
 0x2ae   : > { %v791_v35 = vsel %vm788_vm14, %v790_v27, %v786_v28  ;;  %1130 = vrcp.f32 %v733_v29  ;;  %vm799_vm1 = vmor %vm797_vm0, %vm798_vm15  ;;  %v815_v63 = vand.u32 2147483647, %v733_v29  ;;  %vm811_vm5 = vweird.f32 %v733_v29 }
 0x2af   : > { %v934_v36 = vmul.f32 %v1376_v34, %v791_v35  ;;  %v794_v37 = vsub.f32 1.0, %v793_v31 }
 0x2b0   : > { %vm816_vm7 = vcmp.eq.f32.partialorder %v815_v63, 8.507059e+37 }
 0x2b1   : > { %v947_v38 = vsel %vm632_vm2, %v934_v36, %v1303_v49  ;;  %v795_v41 = vmul.f32 %v1129_v26, %v794_v37  ;;  %v817_v49 = vand.u32 2147483648, %v733_v29 }
 0x2b2   : > { %960 = vst [vmem:[%s1441_s16 + $0x10] sm:$0xff] %v947_v38 }
 0x2b3   : > { %v796_v44 = vadd.f32 %v1129_v26, %v795_v41  ;;  %v818_v4 = vor.u32 1.1754944e-38, %v817_v49 }
 0x2b4   : > { %v1131_v45 = vpop.eup %1130 }
 0x2b5   : > { %v800_v50 = vsel %vm799_vm1, %v1129_v26, %v796_v44  ;;  %v807_v51 = vmul.f32 %v1131_v45, %v733_v29  ;;  %v735_v34 = vpop.xlane.xlu0 %734  ;;  %vm812_vm4 = vweird.f32 %v1131_v45 }
 0x2b6   : > { %v805_v53 = vsel %vm802_vm3, %v804_v48, %v800_v50  ;;  %1132 = vrcp.f32 %v735_v34  ;;  %vm813_vm6 = vmor %vm811_vm5, %vm812_vm4  ;;  %v829_v16 = vand.u32 2147483647, %v735_v34  ;;  %vm825_vm9 = vweird.f32 %v735_v34 }
 0x2b7   : > { %v935_v56 = vmul.f32 %v1382_v39, %v805_v53  ;;  %v808_v57 = vsub.f32 1.0, %v807_v51 }
 0x2b8   : > { %vm830_vm11 = vcmp.eq.f32.partialorder %v829_v16, 8.507059e+37 }
 0x2b9   : > { %v948_v59 = vsel %vm632_vm2, %v935_v56, %v1308_v52  ;;  %v809_v60 = vmul.f32 %v1131_v45, %v808_v57  ;;  %v831_v52 = vand.u32 2147483648, %v735_v34 }
 0x2ba   : > { %961 = vst [vmem:[%s1441_s16 + $0x18] sm:$0xff] %v948_v59 }
 0x2bb   : > { %v810_v0 = vadd.f32 %v1131_v45, %v809_v60  ;;  %v832_v43 = vor.u32 1.1754944e-38, %v831_v52 }
 0x2bc   : > { %v1133_v2 = vpop.eup %1132 }
 0x2bd   : > { %v814_v5 = vsel %vm813_vm6, %v1131_v45, %v810_v0  ;;  %v821_v7 = vmul.f32 %v1133_v2, %v735_v34  ;;  %v737_v39 = vpop.xlane.xlu1 %736  ;;  %vm826_vm8 = vweird.f32 %v1133_v2 }
 0x2be   : > { %v819_v8 = vsel %vm816_vm7, %v818_v4, %v814_v5  ;;  %1134 = vrcp.f32 %v737_v39  ;;  %vm827_vm10 = vmor %vm825_vm9, %vm826_vm8  ;;  %v843_v31 = vand.u32 2147483647, %v737_v39  ;;  %vm839_vm13 = vweird.f32 %v737_v39 }
 0x2bf   : > { %v936_v12 = vmul.f32 %v1388_v47, %v819_v8  ;;  %v822_v13 = vsub.f32 1.0, %v821_v7 }
 0x2c0   : > { %vm844_vm15 = vcmp.eq.f32.partialorder %v843_v31, 8.507059e+37 }
 0x2c1   : > { %v949_v14 = vsel %vm632_vm2, %v936_v12, %v1313_v55  ;;  %v823_v24 = vmul.f32 %v1133_v2, %v822_v13  ;;  %v845_v55 = vand.u32 2147483648, %v737_v39 }
 0x2c2   : > { %962 = vst [vmem:[%s1441_s16 + $0x20] sm:$0xff] %v949_v14 }
 0x2c3   : > { %v824_v17 = vadd.f32 %v1133_v2, %v823_v24  ;;  %v846_v36 = vor.u32 1.1754944e-38, %v845_v55 }
 0x2c4   : > { %v1135_v18 = vpop.eup %1134 }
 0x2c5   : > { %v828_v19 = vsel %vm827_vm10, %v1133_v2, %v824_v17  ;;  %v835_v20 = vmul.f32 %v1135_v18, %v737_v39  ;;  %v739_v47 = vpop.xlane.xlu2 %738  ;;  %vm840_vm12 = vweird.f32 %v1135_v18 }
 0x2c6   : > { %v833_v22 = vsel %vm830_vm11, %v832_v43, %v828_v19  ;;  %1136 = vrcp.f32 %v739_v47  ;;  %vm841_vm14 = vmor %vm839_vm13, %vm840_vm12  ;;  %v859_v44 = vand.u32 2147483648, %v739_v47  ;;  %v857_v50 = vand.u32 2147483647, %v739_v47 }
 0x2c7   : > { %v937_v23 = vmul.f32 %v1394_v54, %v833_v22  ;;  %v836_v26 = vsub.f32 1.0, %v835_v20  ;;  %vm853_vm1 = vweird.f32 %v739_v47 }
 0x2c8   : > { %v860_v53 = vor.u32 1.1754944e-38, %v859_v44  ;;  %vm858_vm4 = vcmp.eq.f32.partialorder %v857_v50, 8.507059e+37 }
 0x2c9   : > { %v950_v27 = vsel %vm632_vm2, %v937_v23, %v1318_v58  ;;  %v837_v28 = vmul.f32 %v1135_v18, %v836_v26 }
 0x2ca   : > { %963 = vst [vmem:[%s1441_s16 + $0x28] sm:$0xff] %v950_v27 }
 0x2cb   : > { %v838_v29 = vadd.f32 %v1135_v18, %v837_v28 }
 0x2cc   : > { %v1137_v35 = vpop.eup %1136 }
 0x2cd   : > { %v842_v37 = vsel %vm841_vm14, %v1135_v18, %v838_v29  ;;  %v849_v46 = vmul.f32 %v1137_v35, %v739_v47  ;;  %v741_v54 = vpop.xlane.xlu0 %740  ;;  %vm854_vm0 = vweird.f32 %v1137_v35 }
 0x2ce   : > { %v847_v38 = vsel %vm844_vm15, %v846_v36, %v842_v37  ;;  %v745_v41 = vpop.xlane.xlu2 %744  ;;  %1138 = vrcp.f32 %v741_v54  ;;  %vm855_vm3 = vmor %vm853_vm1, %vm854_vm0  ;;  %v871_v4 = vand.u32 2147483647, %v741_v54  ;;  %v873_v5 = vand.u32 2147483648, %v741_v54 }
 0x2cf   : > { %v938_v42 = vmul.f32 %v1400_v62, %v847_v38  ;;  %v850_v58 = vsub.f32 1.0, %v849_v46  ;;  %1140 = vrcp.f32 %v745_v41  ;;  %v901_v39 = vand.u32 2147483648, %v745_v41 }
 0x2d0   : > { %v899_v13 = vand.u32 2147483647, %v745_v41  ;;  %vm867_vm7 = vweird.f32 %v741_v54  ;;  %vm895_vm8 = vweird.f32 %v745_v41  ;;  %v874_v24 = vor.u32 1.1754944e-38, %v873_v5 }
 0x2d1   : > { %v951_v45 = vsel %vm632_vm2, %v938_v42, %v1323_v61  ;;  %v851_v48 = vmul.f32 %v1137_v35, %v850_v58  ;;  %v902_v17 = vor.u32 1.1754944e-38, %v901_v39  ;;  %vm872_vm11 = vcmp.eq.f32.partialorder %v871_v4, 8.507059e+37 }
 0x2d2   : > { %964 = vst [vmem:[%s1441_s16 + $0x30] sm:$0xff] %v951_v45  ;;  %vm900_vm12 = vcmp.eq.f32.partialorder %v899_v13, 8.507059e+37 }
 0x2d3   : > { %v852_v51 = vadd.f32 %v1137_v35, %v851_v48 }
 0x2d4   : > { %v1139_v34 = vpop.eup %1138 }
 0x2d5   : > { %v1141_v56 = vpop.eup %1140  ;;  %v856_v57 = vsel %vm855_vm3, %v1137_v35, %v852_v51  ;;  %v863_v62 = vmul.f32 %v1139_v34, %v741_v54  ;;  %v1478_v49 = vpop.xlane.xlu0 %746  ;;  %vm868_vm5 = vweird.f32 %v1139_v34 }
 0x2d6   : > { %v861_v59 = vsel %vm858_vm4, %v860_v53, %v856_v57  ;;  %v891_v60 = vmul.f32 %v1141_v56, %v745_v41  ;;  %v1480_v63 = vpop.xlane.xlu1 %742  ;;  %1142 = vrcp.f32 %v1478_v49  ;;  %vm896_vm6 = vweird.f32 %v1141_v56  ;;  %vm869_vm9 = vmor %vm867_vm7, %vm868_vm5 }
 0x2d7   : > { %v939_v61 = vmul.f32 %v1409_v10, %v861_v59  ;;  %v864_v0 = vsub.f32 1.0, %v863_v62  ;;  %1144 = vrcp.f32 %v1480_v63  ;;  %vm897_vm10 = vmor %vm895_vm8, %vm896_vm6  ;;  %v887_v28 = vand.u32 2147483648, %v1480_v63 }
 0x2d8   : > { %v892_v2 = vsub.f32 1.0, %v891_v60  ;;  %v915_v31 = vand.u32 2147483648, %v1478_v49  ;;  %v913_v36 = vand.u32 2147483647, %v1478_v49  ;;  %vm909_vm15 = vweird.f32 %v1478_v49 }
 0x2d9   : > { %v952_v7 = vsel %vm632_vm2, %v939_v61, %v1328_v1  ;;  %v865_v8 = vmul.f32 %v1139_v34, %v864_v0  ;;  %vm881_vm0 = vweird.f32 %v1480_v63  ;;  %v888_v41 = vor.u32 1.1754944e-38, %v887_v28 }
 0x2da   : > { %965 = vst [vmem:[%s1441_s16 + $0x38] sm:$0xff] %v952_v7  ;;  %v893_v12 = vmul.f32 %v1141_v56, %v892_v2  ;;  %vm914_vm4 = vcmp.eq.f32.partialorder %v913_v36, 8.507059e+37 }
 0x2db   : > { %v866_v52 = vadd.f32 %v1139_v34, %v865_v8 }
 0x2dc   : > { %v1143_v10 = vpop.eup %1142  ;;  %v894_v14 = vadd.f32 %v1141_v56, %v893_v12 }
 0x2dd   : > { %v1145_v16 = vpop.eup %1144  ;;  %v870_v18 = vsel %vm869_vm9, %v1139_v34, %v866_v52  ;;  %v905_v1 = vmul.f32 %v1143_v10, %v1478_v49  ;;  %vm910_vm13 = vweird.f32 %v1143_v10 }
 0x2de   : > { %v898_v43 = vsel %vm897_vm10, %v1141_v56, %v894_v14  ;;  %v875_v19 = vsel %vm872_vm11, %v874_v24, %v870_v18  ;;  %v877_v20 = vmul.f32 %v1145_v16, %v1480_v63  ;;  %v749_v47 = vpop.xlane.xlu1 %748  ;;  %vm882_vm14 = vweird.f32 %v1145_v16  ;;  %vm911_vm1 = vmor %vm909_vm15, %vm910_vm13 }
 0x2df   : > { %v903_v22 = vsel %vm900_vm12, %v902_v17, %v898_v43  ;;  %v940_v23 = vmul.f32 %v1418_v21, %v875_v19  ;;  %v906_v26 = vsub.f32 1.0, %v905_v1  ;;  %1146 = vrcp.f32 %v749_v47  ;;  %vm883_vm3 = vmor %vm881_vm0, %vm882_vm14 }
 0x2e0   : > { %v942_v55 = vmul.f32 %v1420_v25, %v903_v22  ;;  %v878_v27 = vsub.f32 1.0, %v877_v20  ;;  %v885_v25 = vand.u32 2147483647, %v1480_v63  ;;  %v929_v53 = vand.u32 2147483648, %v749_v47 }
 0x2e1   : > { %v953_v29 = vsel %vm632_vm2, %v940_v23, %v1335_v6  ;;  %v907_v35 = vmul.f32 %v1143_v10, %v906_v26  ;;  %v916_v6 = vor.u32 1.1754944e-38, %v915_v31  ;;  %v927_v62 = vand.u32 2147483647, %v749_v47 }
 0x2e2   : > { %v955_v21 = vsel %vm632_vm2, %v942_v55, %v1333_v3  ;;  %966 = vst [vmem:[%s1441_s16 + $0x40] sm:$0xff] %v953_v29  ;;  %v879_v37 = vmul.f32 %v1145_v16, %v878_v27  ;;  %vm886_vm5 = vcmp.eq.f32.partialorder %v885_v25, 8.507059e+37  ;;  %vm923_vm7 = vweird.f32 %v749_v47 }
 0x2e3   : > { %968 = vst [vmem:[%s1441_s16 + $0x50] sm:$0xff] %v955_v21  ;;  %v908_v46 = vadd.f32 %v1143_v10, %v907_v35  ;;  %vm928_vm9 = vcmp.eq.f32.partialorder %v927_v62, 8.507059e+37 }
 0x2e4   : > { %v880_v54 = vadd.f32 %v1145_v16, %v879_v37 }
 0x2e5   : > { %v1147_v38 = vpop.eup %1146  ;;  %v912_v42 = vsel %vm911_vm1, %v1143_v10, %v908_v46 }
 0x2e6   : > { %v884_v3 = vsel %vm883_vm3, %v1145_v16, %v880_v54  ;;  %v917_v58 = vsel %vm914_vm4, %v916_v6, %v912_v42  ;;  %v919_v44 = vmul.f32 %v1147_v38, %v749_v47  ;;  %vm924_vm6 = vweird.f32 %v1147_v38 }
 0x2e7   : > { %v889_v45 = vsel %vm886_vm5, %v888_v41, %v884_v3  ;;  %v943_v48 = vmul.f32 %v1427_v30, %v917_v58  ;;  %vm925_vm8 = vmor %vm923_vm7, %vm924_vm6  ;;  %v930_v30 = vor.u32 1.1754944e-38, %v929_v53 }
 0x2e8   : > { %v941_v50 = vmul.f32 %v1429_v32, %v889_v45  ;;  %v920_v51 = vsub.f32 1.0, %v919_v44 }
 0x2e9   : > { %v956_v34 = vsel %vm632_vm2, %v943_v48, %v1343_v9 }
 0x2ea   : > { %v954_v56 = vsel %vm632_vm2, %v941_v50, %v1345_v11  ;;  %969 = vst [vmem:[%s1441_s16 + $0x58] sm:$0xff] %v956_v34  ;;  %v921_v57 = vmul.f32 %v1147_v38, %v920_v51 }
 0x2eb   : > { %967 = vst [vmem:[%s1441_s16 + $0x48] sm:$0xff] %v954_v56 }
 0x2ec   : > { %v922_v49 = vadd.f32 %v1147_v38, %v921_v57 }
 0x2ee   : > { %v926_v32 = vsel %vm925_vm8, %v1147_v38, %v922_v49 }
 0x2ef   : > { %v931_v59 = vsel %vm928_vm9, %v930_v30, %v926_v32 }
 0x2f0   : > { %v944_v9 = vmul.f32 %v1433_v33, %v931_v59 }
 0x2f2   : > { %v957_v60 = vsel %vm632_vm2, %v944_v9, %v1353_v15 }
 0x2f3   : > { %970 = vst [vmem:[%s1441_s16 + $0x60] sm:$0xff] %v957_v60 }
 0x2f4 PF: > { %s17_s24 = sadd.s32 1, %s1154_s24  }
 0x2f5   : > { %p14_p4 = scmp.ge.s32.totalorder %s17_s24, 4  }
 0x2f7   :  { %16 = sbr.rel (!%p14_p4) target bundleno = 1 (0x1), region = 78 }

</bundles_post_ra>
